<compile_context>
chip_gen: v6e
topology: v6e:2x2x1
jax: 0.10.0
libtpu: 0.0.40
codegen_flags: <defaults>
</compile_context>

<pallas_src>
import jax
import jax.numpy as jnp
from jax import lax
from jax.experimental import pallas as pl
from jax.experimental.pallas import tpu as pltpu


def _encoder_kernel(x_ref, w_ref, b_ref, out_ref):
    # x:   [B, D]   bf16   (VMEM)
    # w:   [2L, D]  bf16   lane-dense nn.Linear [out, in] layout
    # b:   [1, 2L]  f32
    # out: [B, 2L]  f32    (mu || log_var, split outside the kernel)
    acc = lax.dot_general(
        x_ref[...], w_ref[...],
        dimension_numbers=(((1,), (1,)), ((), ())),   # contract D with D
        preferred_element_type=jnp.float32,
    )
    out_ref[...] = acc + b_ref[...]


def encoder_forward(x_nchw, w_mu, b_mu, w_lv, b_lv):
    """Computes (mu, log_var) for a flattened-linear VAE encoder.

    x_nchw: [B, C, H, W] float32
    w_mu, w_lv: [L, D] float32 (nn.Linear [out, in] layout), D = C*H*W
    b_mu, b_lv: [L] float32
    returns: mu [B, L], log_var [B, L]  (float32)
    """
    B = x_nchw.shape[0]
    D = x_nchw.shape[1] * x_nchw.shape[2] * x_nchw.shape[3]
    L = w_mu.shape[0]

    # Flatten (same semantics as torch .view(B, -1)) and fuse the two heads.
    x_flat = x_nchw.reshape(B, D).astype(jnp.bfloat16)
    w_cat = jnp.concatenate([w_mu, w_lv], axis=0).astype(jnp.bfloat16)   # [2L, D]
    b_cat = jnp.concatenate([b_mu, b_lv], axis=0).reshape(1, 2 * L)      # [1, 2L] f32

    # Tiny problem (B=2, D=1024, 2L=64): full-array blocks, single grid step.
    # TODO(synk): if B or D grows, add a parallel batch grid axis (v7x dual
    #             TCs) and a K-tiled accumulator sized to 64 MiB VMEM on v7x.
    full = lambda shape: pl.BlockSpec(shape, lambda: (0,) * len(shape))

    cost = pl.CostEstimate(
        flops=2 * B * D * (2 * L),
        transcendentals=0,
        bytes_accessed=(x_flat.size * 2 + w_cat.size * 2
                        + b_cat.size * 4 + B * 2 * L * 4),
    )

    out = pl.pallas_call(
        _encoder_kernel,
        out_shape=jax.ShapeDtypeStruct((B, 2 * L), jnp.float32),
        in_specs=[
            full((B, D)),
            full((2 * L, D)),
            full((1, 2 * L)),
        ],
        out_specs=full((B, 2 * L)),
        cost_estimate=cost,
    )(x_flat, w_cat, b_cat)

    mu = out[:, :L]
    log_var = out[:, L:]
    return mu, log_var


if __name__ == "__main__":
    # Small shapes consistent with a VAE encoder over image-like input.
    B, C, H, W = 2, 4, 16, 16
    latent_dim = 32
    D = C * H * W

    key = jax.random.PRNGKey(0)
    kx, kwm, kbm, kwl, kbl = jax.random.split(key, 5)

    x = jax.random.normal(kx, (B, C, H, W), dtype=jnp.float32)

    # Deterministic nn.Linear-style init (uniform in +/- 1/sqrt(fan_in)),
    # stored in nn.Linear's native [out, in] layout.
    bound = 1.0 / (D ** 0.5)
    w_mu = jax.random.uniform(kwm, (latent_dim, D), jnp.float32, -bound, bound)
    b_mu = jax.random.uniform(kbm, (latent_dim,), jnp.float32, -bound, bound)
    w_lv = jax.random.uniform(kwl, (latent_dim, D), jnp.float32, -bound, bound)
    b_lv = jax.random.uniform(kbl, (latent_dim,), jnp.float32, -bound, bound)

    mu, log_var = jax.jit(encoder_forward)(x, w_mu, b_mu, w_lv, b_lv)
    jax.block_until_ready((mu, log_var))

    # Reference check in plain JAX.
    x_flat = x.reshape(B, D)
    # bf16-quantized reference (matches the kernel's input precision).
    xb = x_flat.astype(jnp.bfloat16).astype(jnp.float32)
    wmb = w_mu.astype(jnp.bfloat16).astype(jnp.float32)
    wlb = w_lv.astype(jnp.bfloat16).astype(jnp.float32)
    mu_ref_bf = xb @ wmb.T + b_mu
    lv_ref_bf = xb @ wlb.T + b_lv
    # full-f32 reference (loose tolerance; bf16 inputs on the head are fine for a VAE).
    mu_ref_f32 = x_flat @ w_mu.T + b_mu
    lv_ref_f32 = x_flat @ w_lv.T + b_lv

    assert mu.shape == (B, latent_dim) and log_var.shape == (B, latent_dim)
    assert jnp.allclose(mu, mu_ref_bf, atol=2e-3, rtol=2e-3)
    assert jnp.allclose(log_var, lv_ref_bf, atol=2e-3, rtol=2e-3)
    assert jnp.allclose(mu, mu_ref_f32, atol=5e-2, rtol=5e-2)
    assert jnp.allclose(log_var, lv_ref_f32, atol=5e-2, rtol=5e-2)

    print("KERNEL_OK")
</pallas_src>

<mosaic_0001>
module attributes {stable_mosaic.version = 11 : i64} {
  func.func @_encoder_kernel(%arg0: memref<2x1024xbf16, #tpu.memory_space<vmem>>, %arg1: memref<64x1024xbf16, #tpu.memory_space<vmem>>, %arg2: memref<1x64xf32, #tpu.memory_space<vmem>>, %arg3: memref<2x64xf32, #tpu.memory_space<vmem>>) attributes {dimension_semantics = [], scalar_prefetch = 0 : i64, scratch_operands = 0 : i64, tpu.core_type = #tpu.core_type<tc>} {
    %c0 = arith.constant 0 : index
    %c0_0 = arith.constant 0 : index
    %0 = vector.load %arg0[%c0, %c0_0] : memref<2x1024xbf16, #tpu.memory_space<vmem>>, vector<2x1024xbf16>
    %c0_1 = arith.constant 0 : index
    %c0_2 = arith.constant 0 : index
    %1 = vector.load %arg1[%c0_1, %c0_2] : memref<64x1024xbf16, #tpu.memory_space<vmem>>, vector<64x1024xbf16>
    %cst = arith.constant dense<0.000000e+00> : vector<2x64xf32>
    %2 = tpu.matmul %0, %1, %cst {dimension_numbers = #tpu.dot_dimension_numbers<[1], [1], [0], [0], [0, 0, 1, 0], [], []>} : vector<2x1024xbf16>, vector<64x1024xbf16>, vector<2x64xf32> -> vector<2x64xf32>
    %c0_3 = arith.constant 0 : index
    %c0_4 = arith.constant 0 : index
    %3 = vector.load %arg2[%c0_3, %c0_4] : memref<1x64xf32, #tpu.memory_space<vmem>>, vector<1x64xf32>
    %4 = vector.broadcast %3 : vector<1x64xf32> to vector<2x64xf32>
    %5 = arith.addf %2, %4 : vector<2x64xf32>
    %c0_5 = arith.constant 0 : index
    %c0_6 = arith.constant 0 : index
    %6 = vector.load %arg3[%c0_5, %c0_6] : memref<2x64xf32, #tpu.memory_space<vmem>>, vector<2x64xf32>
    tpu.vector_store %arg3[%c0_5, %c0_6], %5 {strides = array<i32>} : memref<2x64xf32, #tpu.memory_space<vmem>>, vector<2x64xf32>,
    return
  }
}

</mosaic_0001>

<bundles_post_ra>
// kernel: encoder_forward.1
= control target key start
LH: loop header
LB: loop body
LE: loop exit
PB: predicated region body
PF: predicated region fallthrough
CT: control target
= control target key end

     0   :  { %v60_v0 = vlaneseq  ;;  %v474_v4 = vmov 1966171168   ;;  %vm433_vm0 = vcmask 517120   ;;  %s608_s1 = inlined_call_operand.vmem [shape: bf16[64,1024], index: 1, kind: input, shape index: {}]   ;;  %s609_s0 = inlined_call_operand.vmem [shape: bf16[2,1024], index: 0, kind: input, shape index: {}]   ;;  %s610_s2 = inlined_call_operand.vmem [shape: f32[1,64], index: 2, kind: input, shape index: {}]   ;;  %s611_s3 = inlined_call_operand.vmem [shape: f32[2,64], index: 3, kind: output, shape index: {}]  }
   0x1   :  { %v40_v1 = vld [vmem:[%s608_s1 + $0xc0] sm:$0xff]  ;;  %v41_v3 = vld [vmem:[%s608_s1 + $0xc8] sm:$0xff]  ;;  %v58_v5 = vunpack.c.l.s4 %v474_v4  ;;  %v42_v42 = vld [vmem:[%s608_s1 + $0xd0] sm:$0xff] }
   0x2   :  { %v44_v2 = vld [vmem:[%s608_s1 + $0xe0] sm:$0xff]  ;;  %v45_v7 = vld [vmem:[%s608_s1 + $0xe8] sm:$0xff]  ;;  %v61_v16 = vshrl.u32 %v60_v0, 7  ;;  %v46_v43 = vld [vmem:[%s608_s1 + $0xf0] sm:$0xff] }
   0x3   :  { %v465_v6 = vcombine.high %v40_v1, %v44_v2  ;;  %v464_v8 = vcombine.low %v40_v1, %v44_v2  ;;  %v32_v9 = vld [vmem:[%s608_s1 + $0x80] sm:$0xff]  ;;  %v467_v11 = vcombine.high %v41_v3, %v45_v7  ;;  %v466_v12 = vcombine.low %v41_v3, %v45_v7  ;;  %v33_v14 = vld [vmem:[%s608_s1 + $0x88] sm:$0xff]  ;;  %v43_v44 = vld [vmem:[%s608_s1 + $0xd8] sm:$0xff] }
   0x4   :  { %v36_v10 = vld [vmem:[%s608_s1 + $0xa0] sm:$0xff]  ;;  %v37_v15 = vld [vmem:[%s608_s1 + $0xa8] sm:$0xff]  ;;  %v59_v18 = vunpack.c.0.s8 %v58_v5  ;;  %v47_v45 = vld [vmem:[%s608_s1 + $0xf8] sm:$0xff]  ;;  %v469_v49 = vcombine.high %v42_v42, %v46_v43  ;;  %v468_v59 = vcombine.low %v42_v42, %v46_v43 }
   0x5   :  { %v457_v13 = vcombine.high %v32_v9, %v36_v10  ;;  %281 = vmatprep.subr.bf16.mxu0 %v465_v6  ;;  %v459_v17 = vcombine.high %v33_v14, %v37_v15  ;;  %321 = vmatprep.subr.bf16.mxu1 %v467_v11  ;;  %v15_v19 = vld [vmem:[%s609_s0] sm:$0xff]  ;;  %v25_v23 = vld [vmem:[%s608_s1 + $0x48] sm:$0xff]  ;;  %v456_v25 = vcombine.low %v32_v9, %v36_v10  ;;  %v34_v53 = vld [vmem:[%s608_s1 + $0x90] sm:$0xff] }
   0x6   :  { %282 = vmatpush1.bf16.xpose.msra.mxu0 %v464_v8  ;;  %322 = vmatpush1.bf16.xpose.msra.mxu1 %v466_v12  ;;  %v24_v20 = vld [vmem:[%s608_s1 + $0x40] sm:$0xff]  ;;  %v528_v22 = vsub.s32 %v59_v18, %v61_v16  ;;  %v29_v24 = vld [vmem:[%s608_s1 + $0x68] sm:$0xff]  ;;  %v458_v27 = vcombine.low %v33_v14, %v37_v15  ;;  %v56_v41 = vcombine.high %v15_v19, %v15_v19  ;;  %v38_v54 = vld [vmem:[%s608_s1 + $0xb0] sm:$0xff] }
   0x7   :  { %283 = vmatprep.subr.bf16.mxu0 %v457_v13  ;;  %323 = vmatprep.subr.bf16.mxu1 %v459_v17  ;;  %v28_v21 = vld [vmem:[%s608_s1 + $0x60] sm:$0xff]  ;;  %v451_v29 = vcombine.high %v25_v23, %v29_v24  ;;  %v17_v35 = vld [vmem:[%s608_s1 + $0x8] sm:$0xff]  ;;  %v450_v38 = vcombine.low %v25_v23, %v29_v24  ;;  %v471_v50 = vcombine.high %v43_v44, %v47_v45  ;;  %v35_v55 = vld [vmem:[%s608_s1 + $0x98] sm:$0xff] }
   0x8   :  { %v63_v26 = vrot.slane %v15_v19, %v528_v22  ;;  %v449_v28 = vcombine.high %v24_v20, %v28_v21  ;;  %v16_v32 = vld [vmem:[%s608_s1] sm:$0xff]  ;;  %v21_v36 = vld [vmem:[%s608_s1 + $0x28] sm:$0xff]  ;;  %v448_v37 = vcombine.low %v24_v20, %v28_v21  ;;  %v70_v46 = vrot.slane %v56_v41, %v528_v22  ;;  %v39_v56 = vld [vmem:[%s608_s1 + $0xb8] sm:$0xff] }
   0x9   :  { %v20_v33 = vld [vmem:[%s608_s1 + $0x20] sm:$0xff]  ;;  %v443_v40 = vcombine.high %v17_v35, %v21_v36  ;;  %v442_v48 = vcombine.low %v17_v35, %v21_v36  ;;  %v470_v60 = vcombine.low %v43_v44, %v47_v45  ;;  %v461_v61 = vcombine.high %v34_v53, %v38_v54  ;;  %v26_v0 = vld [vmem:[%s608_s1 + $0x50] sm:$0xff]  ;;  %v27_v2 = vld [vmem:[%s608_s1 + $0x58] sm:$0xff] }
   0xa   :  { %v71_v30 = vcombine.high %v63_v26, %v63_v26  ;;  %v441_v39 = vcombine.high %v16_v32, %v20_v33  ;;  %v440_v47 = vcombine.low %v16_v32, %v20_v33  ;;  %v72_v51 = vcombine.high %v70_v46, %v70_v46  ;;  %v30_v1 = vld [vmem:[%s608_s1 + $0x70] sm:$0xff]  ;;  %v31_v3 = vld [vmem:[%s608_s1 + $0x78] sm:$0xff] }
   0xb   :  { %v79_v52 = vrot.slane %v63_v26, %v528_v22  ;;  %v463_v62 = vcombine.high %v35_v55, %v39_v56  ;;  %v460_v4 = vcombine.low %v34_v53, %v38_v54  ;;  %v462_v5 = vcombine.low %v35_v55, %v39_v56  ;;  %v18_v8 = vld [vmem:[%s608_s1 + $0x10] sm:$0xff]  ;;  %v19_v10 = vld [vmem:[%s608_s1 + $0x18] sm:$0xff] }
   0xc   :  { %v93_v31 = vrot.slane %v71_v30, %v528_v22  ;;  %v100_v57 = vrot.slane %v72_v51, %v528_v22  ;;  %v453_v6 = vcombine.high %v26_v0, %v30_v1  ;;  %v455_v7 = vcombine.high %v27_v2, %v31_v3  ;;  %v22_v9 = vld [vmem:[%s608_s1 + $0x30] sm:$0xff]  ;;  %v23_v11 = vld [vmem:[%s608_s1 + $0x38] sm:$0xff] }
   0xd   :  { %v101_v58 = vcombine.high %v79_v52, %v79_v52  ;;  %v452_v12 = vcombine.low %v26_v0, %v30_v1  ;;  %v454_v13 = vcombine.low %v27_v2, %v31_v3  ;;  %v445_v14 = vcombine.high %v18_v8, %v22_v9 }
   0xe   :  { %284 = vmatpush1.bf16.xpose.msra.mxu0 %v456_v25  ;;  %324 = vmatpush1.bf16.xpose.msra.mxu1 %v458_v27  ;;  %v103_v34 = vcombine.high %v93_v31, %v93_v31  ;;  %v104_v63 = vcombine.high %v100_v57, %v100_v57  ;;  %v447_v15 = vcombine.high %v19_v10, %v23_v11 }
   0xf   :  { %285 = vmatprep.subr.bf16.mxu0 %v449_v28  ;;  %325 = vmatprep.subr.bf16.mxu1 %v451_v29  ;;  %v444_v16 = vcombine.low %v18_v8, %v22_v9  ;;  %v446_v17 = vcombine.low %v19_v10, %v23_v11  ;;  %v86_v18 = vrot.slane %v70_v46, %v528_v22  ;;  %v439_v29 = vld [vmem:[%s610_s2] ss:$0 sm:$0xff] }
  0x10   :  { %305 = vmatprep.mubr.bf16.mxu0 %v93_v31  ;;  %345 = vmatprep.mubr.bf16.mxu1 %v103_v34 }
  0x11   :  { %v102_v19 = vcombine.high %v86_v18, %v86_v18 }
  0x16   :  { %286 = vmatpush1.bf16.xpose.msra.mxu0 %v448_v37  ;;  %326 = vmatpush1.bf16.xpose.msra.mxu1 %v450_v38 }
  0x17   :  { %287 = vmatprep.subr.bf16.mxu0 %v441_v39  ;;  %327 = vmatprep.subr.bf16.mxu1 %v443_v40 }
  0x1e   :  { %288 = vmatpush1.bf16.xpose.msra.mxu0 %v440_v47  ;;  %328 = vmatpush1.bf16.xpose.msra.mxu1 %v442_v48 }
  0x1f   :  { %361 = vmatprep.subr.bf16.mxu0 %v469_v49  ;;  %401 = vmatprep.subr.bf16.mxu1 %v471_v50 }
  0x25   :  { %306 = vmatmul.mubr.bf16.vlgmr.msra.gmra.mxu0 %v79_v52  ;;  %346 = vmatmul.mubr.bf16.vlgmr.msra.gmra.mxu1 %v101_v58 }
  0x26   :  { %362 = vmatpush1.bf16.xpose.msra.mxu0 %v468_v59  ;;  %402 = vmatpush1.bf16.xpose.msra.mxu1 %v470_v60 }
  0x27   :  { %363 = vmatprep.subr.bf16.mxu0 %v461_v61  ;;  %403 = vmatprep.subr.bf16.mxu1 %v463_v62 }
  0x28   :  { %385 = vmatprep.mubr.bf16.mxu0 %v100_v57  ;;  %425 = vmatprep.mubr.bf16.mxu1 %v104_v63 }
  0x2e   :  { %364 = vmatpush1.bf16.xpose.msra.mxu0 %v460_v4  ;;  %404 = vmatpush1.bf16.xpose.msra.mxu1 %v462_v5 }
  0x2f   :  { %365 = vmatprep.subr.bf16.mxu0 %v453_v6  ;;  %405 = vmatprep.subr.bf16.mxu1 %v455_v7 }
  0x36   :  { %366 = vmatpush1.bf16.xpose.msra.mxu0 %v452_v12  ;;  %406 = vmatpush1.bf16.xpose.msra.mxu1 %v454_v13 }
  0x37   :  { %367 = vmatprep.subr.bf16.mxu0 %v445_v14  ;;  %407 = vmatprep.subr.bf16.mxu1 %v447_v15 }
  0x3e   :  { %368 = vmatpush1.bf16.xpose.msra.mxu0 %v444_v16  ;;  %408 = vmatpush1.bf16.xpose.msra.mxu1 %v446_v17 }
  0x45   :  { %386 = vmatmul.mubr.bf16.vlgmr.msra.gmra.mxu0 %v86_v18  ;;  %426 = vmatmul.mubr.bf16.vlgmr.msra.gmra.mxu1 %v102_v19 }
  0xe5   :  { %v307_v20 = vpop.f32.mrf.mxu0  ;;  %v347_v21 = vpop.f32.mrf.mxu1 }
  0xe6   :  { %v308_v30 = vadd.f32 %v439_v29, %v307_v20 }
  0xe7   :  { %v309_v23 = vpop.f32.mrf.mxu0  ;;  %v349_v24 = vpop.f32.mrf.mxu1 }
  0xe8   :  { %v348_v31 = vadd.f32 %v347_v21, %v308_v30 }
  0xe9   :  { %v310_v25 = vpop.f32.mrf.mxu0  ;;  %v350_v26 = vpop.f32.mrf.mxu1 }
  0xeb   :  { %v311_v27 = vpop.f32.mrf.mxu0  ;;  %v351_v28 = vpop.f32.mrf.mxu1 }
 0x105   :  { %v387_v32 = vpop.f32.mrf.mxu0  ;;  %v427_v33 = vpop.f32.mrf.mxu1 }
 0x106   :  { %v388_v22 = vadd.f32 %v387_v32, %v348_v31 }
 0x107   :  { %v389_v34 = vpop.f32.mrf.mxu0  ;;  %v429_v36 = vpop.f32.mrf.mxu1 }
 0x108   :  { %v428_v35 = vadd.f32 %v427_v33, %v388_v22 }
 0x109   :  { %v390_v37 = vpop.f32.mrf.mxu0  ;;  %v430_v38 = vpop.f32.mrf.mxu1 }
 0x10a   :  { %434 = vst.msk [vmem:[%s611_s3] sm:$0x3] %vm433_vm0, %v428_v35 }
 0x10b   :  { %v391_v39 = vpop.f32.mrf.mxu0  ;;  %v431_v40 = vpop.f32.mrf.mxu1 }

</bundles_post_ra>
